<compile_context>
chip_gen: v5e
topology: v5e:2x2
jax: 0.10.0
libtpu: 0.0.40
codegen_flags: <defaults>
</compile_context>

<pallas_src>
import math

import jax
import jax.numpy as jnp
from jax.experimental import pallas as pl
from jax.experimental.pallas import tpu as pltpu

MAX_LEN = 1000
_DEFAULT_TILE_BYTES = 4 << 20     # ~4 MiB per x block
_XLA_FALLBACK_BYTES = 256 << 10   # below this, a fused XLA broadcast-add wins


def make_pe_table(d_model: int, max_len: int = MAX_LEN) -> jnp.ndarray:
    """Deterministic sinusoidal positional-encoding table, shape [max_len, d_model]."""
    position = jnp.arange(0, max_len, dtype=jnp.float32)[:, None]
    div_term = jnp.exp(
        jnp.arange(0, d_model, 2, dtype=jnp.float32) * (-math.log(10000.0) / d_model)
    )
    ang = position * div_term
    pe = jnp.zeros((max_len, d_model), dtype=jnp.float32)
    pe = pe.at[:, 0::2].set(jnp.sin(ang))
    pe = pe.at[:, 1::2].set(jnp.cos(ang))
    return pe


def _pe_add_kernel(x_ref, pe_ref, o_ref):
    # Works for both layouts via jnp broadcasting:
    #   layout A: x/o (TB, TN),      pe (1, TN)   -> sublane broadcast of pe
    #   layout B: x/o (1, TR, TN),   pe (TR, TN)  -> leading unit dim of x
    o_ref[...] = x_ref[...] + pe_ref[...]


def _round_down(v: int, m: int) -> int:
    return (v // m) * m


def _sublane_rows(itemsize: int) -> int:
    # Native vreg sublane packing: f32 -> 8, bf16/f16 -> 16, int8/fp8 -> 32.
    return max(8, 32 // itemsize)


def _pick_tiles(rows: int, cols: int, itemsize: int, row_gran: int, budget_bytes: int):
    """Pick (row_tile, col_tile) for a 2-D slab within a per-block byte budget.

    Lane tile first (as wide as the budget allows while keeping >= row_gran rows),
    then the row tile from what remains.  Each tile dim is either a multiple of its
    hardware granularity (row_gran / 128) or the full extent, so ragged cdiv grids
    stay legal under the (8, 128) BlockSpec constraint.
    """
    budget_bytes = max(budget_bytes, row_gran * 128 * itemsize)
    lane_cap = max(128, budget_bytes // (row_gran * itemsize))
    tc = cols if cols <= lane_cap else max(128, _round_down(lane_cap, 128))
    row_cap = max(row_gran, budget_bytes // (tc * itemsize))
    tr = rows if rows <= row_cap else max(row_gran, _round_down(row_cap, row_gran))
    return tr, tc


def positional_encoding_forward(
    x: jnp.ndarray,
    pe_table: jnp.ndarray,
    *,
    max_tile_bytes: int = _DEFAULT_TILE_BYTES,
    donate_x: bool = False,
    force_pallas: bool = False,
) -> jnp.ndarray:
    """x: [B, S, D]; returns x + pe[:S] broadcast over batch (Pallas on TPU)."""
    B, S, D = x.shape
    max_len, d_model = pe_table.shape
    if S > max_len:
        raise ValueError(f"seq_len={S} exceeds positional-encoding max_len={max_len}")
    if D != d_model:
        raise ValueError(f"d_model mismatch: x has {D}, pe table has {d_model}")

    pe = pe_table[:S, :].astype(x.dtype)          # cast once, in the wrapper
    itemsize = x.dtype.itemsize
    total_bytes = B * S * D * itemsize

    # Tiny inputs: pallas_call launch / per-step overhead dominates -> plain XLA.
    if not force_pallas and total_bytes < _XLA_FALLBACK_BYTES:
        return x + pe[None, :, :]

    row_gran = _sublane_rows(itemsize)
    io_aliases = {0: 0} if donate_x else {}
    cost = pl.CostEstimate(
        flops=B * S * D,
        transcendentals=0,
        bytes_accessed=(2 * B * S * D + S * D) * itemsize,
    )

    # ------------------------------------------------------------------ layout B
    # Small batch (B < sublane packing) with a lane-dense model dim: fill sublanes
    # from the sequence axis.  x stays 3-D; grid = (seq_tiles, d_tiles, B) with the
    # batch axis innermost so the pe block index (si, di) is constant across it and
    # Pallas does not re-DMA pe per batch element.
    if B < row_gran and D % 128 == 0:
        tr, tn = _pick_tiles(S, D, itemsize, row_gran, max_tile_bytes)
        grid = (pl.cdiv(S, tr), pl.cdiv(D, tn), B)
        blk_bytes = tr * tn * itemsize
        # double-buffered x + out + pe blocks, plus headroom
        vmem_limit = min(max(6 * blk_bytes + (4 << 20), 16 << 20), 48 << 20)
        return pl.pallas_call(
            _pe_add_kernel,
            out_shape=jax.ShapeDtypeStruct((B, S, D), x.dtype),
            grid_spec=pltpu.PrefetchScalarGridSpec(
                num_scalar_prefetch=0,
                grid=grid,
                in_specs=[
                    pl.BlockSpec((1, tr, tn), lambda si, di, b: (b, si, di)),  # x
                    pl.BlockSpec((tr, tn), lambda si, di, b: (si, di)),        # pe
                ],
                out_specs=pl.BlockSpec((1, tr, tn), lambda si, di, b: (b, si, di)),
            ),
            compiler_params=pltpu.CompilerParams(
                dimension_semantics=("parallel", "parallel", "parallel"),
                vmem_limit_bytes=vmem_limit,
            ),
            cost_estimate=cost,
            input_output_aliases=io_aliases,
        )(x, pe)

    # ------------------------------------------------------------------ layout A
    # General case: flatten (S, D) onto the lane axis for lane-dense, unmasked
    # stores; batch rows on the sublane axis.  Column tiles are the OUTER grid dim
    # so the tiny (1, TN) pe block is only re-fetched when the column tile changes
    # (total pe HBM traffic = S*D bytes).  With the 4 MiB budget the column axis is
    # usually a single tile, i.e. pe is effectively resident.
    N = S * D
    x2 = x.reshape(B, N)
    pe2 = pe.reshape(1, N)
    tb, tn = _pick_tiles(B, N, itemsize, row_gran, max_tile_bytes)
    grid = (pl.cdiv(N, tn), pl.cdiv(B, tb))
    blk_bytes = tb * tn * itemsize
    pe_blk_bytes = tn * itemsize
    vmem_limit = min(max(4 * blk_bytes + 2 * pe_blk_bytes + (4 << 20), 16 << 20), 48 << 20)
    out2 = pl.pallas_call(
        _pe_add_kernel,
        out_shape=jax.ShapeDtypeStruct((B, N), x.dtype),
        grid_spec=pltpu.PrefetchScalarGridSpec(
            num_scalar_prefetch=0,
            grid=grid,
            in_specs=[
                pl.BlockSpec((tb, tn), lambda j, i: (i, j)),   # x tile
                pl.BlockSpec((1, tn), lambda j, i: (0, j)),    # pe row tile
            ],
            out_specs=pl.BlockSpec((tb, tn), lambda j, i: (i, j)),
        ),
        compiler_params=pltpu.CompilerParams(
            dimension_semantics=("parallel", "parallel"),
            vmem_limit_bytes=vmem_limit,
        ),
        cost_estimate=cost,
        input_output_aliases=io_aliases,
    )(x2, pe2)
    return out2.reshape(B, S, D)


if __name__ == "__main__":
    key = jax.random.PRNGKey(0)
    k1, k2, k3, k4 = jax.random.split(key, 4)

    # 1) Module-spec demo shape: args = {'hidDim': 32}; x: [batch=2, seq=8, d_model=32].
    pe32 = make_pe_table(32, MAX_LEN)
    x1 = jax.random.normal(k1, (2, 8, 32), dtype=jnp.float32)
    out1 = jax.block_until_ready(positional_encoding_forward(x1, pe32, force_pallas=True))
    ref1 = x1 + pe32[None, :8, :]
    assert out1.shape == x1.shape
    assert jnp.allclose(out1, ref1, atol=1e-6, rtol=1e-6)

    # 1b) Default path (tiny input -> XLA fallback) must match too.
    out1b = jax.block_until_ready(positional_encoding_forward(x1, pe32))
    assert jnp.allclose(out1b, ref1, atol=1e-6, rtol=1e-6)

    # 2) Small-batch, lane-dense D -> layout B (sublanes filled from the sequence axis).
    pe128 = make_pe_table(128, MAX_LEN)
    x2 = jax.random.normal(k2, (2, 16, 128), dtype=jnp.float32)
    out2 = jax.block_until_ready(positional_encoding_forward(x2, pe128, force_pallas=True))
    ref2 = x2 + pe128[None, :16, :]
    assert jnp.allclose(out2, ref2, atol=1e-6, rtol=1e-6)

    # 3) Ragged cdiv tiling (layout A, multi-step grid) via an artificially small budget.
    pe40 = make_pe_table(40, MAX_LEN)
    x3 = jax.random.normal(k3, (16, 24, 40), dtype=jnp.float32)
    out3 = jax.block_until_ready(
        positional_encoding_forward(x3, pe40, max_tile_bytes=16 << 10, force_pallas=True)
    )
    ref3 = x3 + pe40[None, :24, :]
    assert jnp.allclose(out3, ref3, atol=1e-6, rtol=1e-6)

    # 4) bf16 input -> dtype-aware sublane packing, layout B.
    pe256 = make_pe_table(256, MAX_LEN)
    x4 = jax.random.normal(k4, (4, 40, 256), dtype=jnp.bfloat16)
    out4 = jax.block_until_ready(positional_encoding_forward(x4, pe256, force_pallas=True))
    ref4 = x4 + pe256[None, :40, :].astype(jnp.bfloat16)
    assert jnp.allclose(out4.astype(jnp.float32), ref4.astype(jnp.float32),
                        atol=1e-2, rtol=1e-2)

    print("KERNEL_OK")
</pallas_src>

<mosaic_0001>
module attributes {stable_mosaic.version = 11 : i64} {
  func.func @_pe_add_kernel(%arg0: i32, %arg1: i32, %arg2: memref<2x256xf32, #tpu.memory_space<vmem>>, %arg3: memref<1x256xf32, #tpu.memory_space<vmem>>, %arg4: memref<2x256xf32, #tpu.memory_space<vmem>>) attributes {dimension_semantics = [#tpu.dimension_semantics<parallel>, #tpu.dimension_semantics<parallel>], iteration_bounds = array<i64: 1, 1>, scalar_prefetch = 0 : i64, scratch_operands = 0 : i64, tpu.core_type = #tpu.core_type<tc>, window_params = [{transform_indices = @transform_0, window_bounds = array<i64: 2, 256>}, {transform_indices = @transform_1, window_bounds = array<i64: 1, 256>}, {transform_indices = @transform_2, window_bounds = array<i64: 2, 256>}]} {
    %c0 = arith.constant 0 : index
    %c0_0 = arith.constant 0 : index
    %0 = vector.load %arg2[%c0, %c0_0] : memref<2x256xf32, #tpu.memory_space<vmem>>, vector<2x256xf32>
    %c0_1 = arith.constant 0 : index
    %c0_2 = arith.constant 0 : index
    %1 = vector.load %arg3[%c0_1, %c0_2] : memref<1x256xf32, #tpu.memory_space<vmem>>, vector<1x256xf32>
    %2 = vector.broadcast %1 : vector<1x256xf32> to vector<2x256xf32>
    %3 = arith.addf %0, %2 : vector<2x256xf32>
    %c0_3 = arith.constant 0 : index
    %c0_4 = arith.constant 0 : index
    %4 = vector.load %arg4[%c0_3, %c0_4] : memref<2x256xf32, #tpu.memory_space<vmem>>, vector<2x256xf32>
    tpu.vector_store %arg4[%c0_3, %c0_4], %3 {strides = array<i32>} : memref<2x256xf32, #tpu.memory_space<vmem>>, vector<2x256xf32>,
    return
  }
  func.func @transform_0(%arg0: i32, %arg1: i32) -> (i32, i32) {
    %c0_i32 = arith.constant 0 : i32
    return %arg1, %arg0 : i32, i32
  }
  func.func @transform_1(%arg0: i32, %arg1: i32) -> (i32, i32) {
    %c0_i32 = arith.constant 0 : i32
    %c0_i32_0 = arith.constant 0 : i32
    return %c0_i32, %arg0 : i32, i32
  }
  func.func @transform_2(%arg0: i32, %arg1: i32) -> (i32, i32) {
    %c0_i32 = arith.constant 0 : i32
    return %arg1, %arg0 : i32, i32
  }
}

</mosaic_0001>

<bundles_post_ra>
// kernel: tpu_custom_call.1
= control target key start
LH: loop header
LB: loop body
LE: loop exit
PB: predicated region body
PF: predicated region fallthrough
CT: control target
= control target key end

     0   :  { %7 = vsyncpa [#allocation3], 0  ;;  %s177_s0 = inlined_call_operand.hbm [shape: f32[2,256], index: 0, kind: input, shape index: {}]   ;;  %s178_s1 = inlined_call_operand.hbm [shape: f32[1,256], index: 1, kind: input, shape index: {}]   ;;  %s179_s2 = inlined_call_operand.hbm [shape: f32[2,256], index: 2, kind: output, shape index: {}]  }
   0x1   :  { %8 = vsyncpa [#allocation6], 0 }
   0x2   :  { %9 = vsyncpa [#allocation4], 0  ;;  %s15_s11 = sshll.u32 %s177_s0, 4  ;;  %s150_s12 = smov [#allocation2]   ;;  %s16_s11 = int_to_ptr.hbm [resolvable:$true] %s15_s11 }
   0x3   :  { %s17_s13 = sshll.u32 %s150_s12, 4  ;;  %s26_s16 = sshll.u32 %s178_s1, 4  ;;  %s18_s13 = int_to_ptr.vmem [resolvable:$true] %s17_s13  ;;  %s27_s16 = int_to_ptr.hbm [resolvable:$true] %s26_s16 }
   0x4   :  { %20 = dma.hbm_to_vmem [thread:$0]  %s16_s11, 64, %s18_s13, [#allocation3]  }
   0x5   :  { %s151_s17 = smov [#allocation5]  }
   0x6   :  { %s28_s18 = sshll.u32 %s151_s17, 4  ;;  %s29_s18 = int_to_ptr.vmem [resolvable:$true] %s28_s18 }
   0x7   :  { %31 = dma.hbm_to_vmem [thread:$0]  %s27_s16, 32, %s29_s18, [#allocation6]  }
   0x8   :  { %144 = dma.done.wait [#allocation3], 64  }
   0x9   :  { %145 = vsyncadd [#allocation3], 4294967232 }
   0xa   :  { %146 = dma.done.wait [#allocation6], 32  }
   0xb   :  { %147 = vsyncadd [#allocation6], 4294967264  ;;  %v41_v0 = vld [vmem:[#allocation5] sm:$0x3]  ;;  %vm46_vm0 = vcmask 1041408   ;;  %s152_s0 = smov [#allocation7]  }
   0xc   :  { %v43_v1 = vperm.slane %v41_v0, 0  ;;  %v44_v2 = vperm.slane %v41_v0, 1  ;;  %v40_v3 = vld [vmem:[#allocation2] sm:$0xf]  ;;  %s56_s19 = sshll.u32 %s152_s0, 4  ;;  %s58_s21 = sshll.u32 %s179_s2, 4  ;;  %s57_s19 = int_to_ptr.vmem [resolvable:$true] %s56_s19  ;;  %s59_s21 = int_to_ptr.hbm [resolvable:$true] %s58_s21 }
   0xe   :  { %v45_v4 = vrot.slane %v44_v2, 6 }
  0x10   :  { %v47_v5 = vsel %vm46_vm0, %v43_v1, %v45_v4 }
  0x11   :  { %v49_v6 = vadd.f32 %v47_v5, %v40_v3 }
  0x13   :  { %50 = vst [vmem:[#allocation7] sm:$0xf] %v49_v6 }
  0x14   :  { %61 = dma.vmem_to_hbm [thread:$0]  %s57_s19, 64, %s59_s21, [#allocation4]  }
  0x15   :  { %148 = dma.done.wait [#allocation4], 64  }
  0x16   :  { %149 = vsyncadd [#allocation4], 4294967232 }
  0x17   :  { %66 = vsyncpa [#allocation3], 1 }
  0x18   :  { %67 = vsyncpa [#allocation6], 1 }
  0x19   :  { %68 = vsyncpa [#allocation4], 1 }

</bundles_post_ra>
